<compile_context>
chip_gen: v7x
topology: tpu7x:2x2x1
jax: 0.10.0
libtpu: 0.0.40
codegen_flags: <defaults>
</compile_context>

<pallas_src>
import functools

import jax
import jax.numpy as jnp
from jax import lax
from jax.experimental import pallas as pl
from jax.experimental.pallas import tpu as pltpu

LANE = 128
SUBLANE = 8


def _device_kind() -> str:
    try:
        return jax.devices()[0].device_kind.lower()
    except Exception:
        return ""


def _chip_flags():
    kind = _device_kind()
    is_v7 = ("v7" in kind) or ("7x" in kind)
    # Chips exposing >1 TensorCore per Pallas device (megacore / dual-TC).
    multi_tc = is_v7 or ("v4" in kind) or ("v5p" in kind)
    return is_v7, multi_tc


def _bce_dice_kernel(pr_ref, gt_ref, out_ref, *,
                     valid_rows, nblocks, block_rows, chunk_rows, n_chunks, steps,
                     mask_partial, skip_duplicate, use_approx_recip):
    i = pl.program_id(1)

    @pl.when(i == 0)
    def _init():
        out_ref[...] = jnp.zeros_like(out_ref)

    blk = pl.program_id(0) * steps + i          # intended (unclamped) block index

    def accumulate(masked):
        def acc_into(k, v):
            if chunk_rows % SUBLANE == 0:
                # (chunk_rows,128) -> (8,128) partial sums: pure VPU vreg adds.
                out_ref[k] = out_ref[k] + v.reshape(-1, SUBLANE, LANE).sum(axis=0)
            else:
                # Tiny single-block case (valid_rows < 8 or not a multiple of 8):
                # sublane-reduce into row 0 of the accumulator.
                out_ref[k, 0:1, :] = out_ref[k, 0:1, :] + jnp.sum(v, axis=0, keepdims=True)

        def chunk_body(c, carry):
            start = pl.multiple_of(c * chunk_rows, chunk_rows)
            x = pr_ref[pl.ds(start, chunk_rows), :].astype(jnp.float32)   # logits
            g = gt_ref[pl.ds(start, chunk_rows), :].astype(jnp.float32)   # targets

            if masked:
                # Only the edge block ever runs this path (gated by pl.when below).
                # Sanitize before any arithmetic so undefined (possibly NaN/Inf) data in
                # the out-of-bounds tail of a partial block cannot propagate.
                row0 = blk * block_rows + c * chunk_rows
                row_global = row0 + lax.broadcasted_iota(jnp.int32, x.shape, 0)
                valid = row_global < valid_rows
                x = jnp.where(valid, x, 0.0)
                g = jnp.where(valid, g, 0.0)
                valid_f = valid.astype(jnp.float32)

            # Shared transcendental: e = exp(-|x|) feeds both sigmoid and stable BCE.
            e = jnp.exp(-jnp.abs(x))
            denom = 1.0 + e
            if use_approx_recip:
                r0 = inv = pl.reciprocal(denom, approx=True)
                inv = r0 * (2.0 - denom * r0)   # one Newton step -> ~f32 accuracy, no divide
            else:
                inv = 1.0 / denom               # exact (hidden under DMA on v5e/v6e)
            s = jnp.where(x >= 0.0, inv, e * inv)                   # sigmoid(x)
            bce_el = jnp.maximum(x, 0.0) - x * g + jnp.log1p(e)     # BCE-with-logits

            if masked:
                s_for_sum = s * valid_f         # zero the sigmoid(0)=0.5 / log(2) of masked rows
                bce_el = bce_el * valid_f
            else:
                s_for_sum = s

            acc_into(0, s * g)          # tp   (g already zeroed where invalid)
            acc_into(1, s_for_sum)      # sum(sigmoid)
            acc_into(2, g)              # sum(gt)
            acc_into(3, bce_el)         # sum(per-element BCE)
            return carry

        lax.fori_loop(0, n_chunks, chunk_body, None, unroll=True)

    if mask_partial:
        is_edge = (blk + 1) * block_rows > valid_rows
        if skip_duplicate:
            in_range = blk < nblocks
            lean_cond = in_range & jnp.logical_not(is_edge)
            mask_cond = in_range & is_edge
        else:
            lean_cond = jnp.logical_not(is_edge)
            mask_cond = is_edge

        @pl.when(lean_cond)
        def _lean():
            accumulate(masked=False)

        @pl.when(mask_cond)
        def _masked():
            accumulate(masked=True)
    elif skip_duplicate:
        @pl.when(blk < nblocks)
        def _in_range():
            accumulate(masked=False)
    else:
        accumulate(masked=False)


def bce_dice_loss(y_pr, y_gt, *, eps=1e-7, lambda_dice=1.0, lambda_bce=1.0,
                  block_rows=None, num_parallel=None):
    """Pallas implementation of BCEDiceLoss(activation='sigmoid').forward.

    y_pr: logits (any float dtype, any shape). y_gt: targets in [0,1], same shape.
    Returns a float32 scalar:  lambda_dice * dice + lambda_bce * BCEWithLogits(mean).
    """
    assert y_pr.shape == y_gt.shape
    n_elems = int(y_pr.size)
    assert n_elems > 0

    is_v7, multi_tc = _chip_flags()

    def _as_flat_float(a):
        # Keep native float dtype (bf16 stays bf16 -> half the HBM bytes); cast to f32
        # inside the kernel.
        if not jnp.issubdtype(a.dtype, jnp.floating):
            a = a.astype(jnp.float32)
        return a.reshape(-1)

    pr_flat = _as_flat_float(y_pr)
    gt_flat = _as_flat_float(y_gt)

    # Kernel consumes the 128-aligned prefix as a free (rows, 128) reshape; no jnp.pad.
    n_main = (n_elems // LANE) * LANE
    rows = n_main // LANE

    tp = jnp.float32(0.0)
    sp = jnp.float32(0.0)
    sg = jnp.float32(0.0)
    bce_sum = jnp.float32(0.0)

    if rows > 0:
        if block_rows is None:
            # Bigger DMA tiles on v7x (2.3x HBM BW, half the VMEM -> compute is sub-chunked);
            # 4096 rows (2 MiB f32 tiles) on v5e/v6e.
            block_rows = 8192 if is_v7 else 4096
        block_rows = max(SUBLANE, (int(block_rows) // SUBLANE) * SUBLANE)
        block_rows_eff = min(block_rows, rows)

        # Sub-chunk the elementwise compute so temporaries stay ~O(512 rows) regardless
        # of the DMA tile size.
        if block_rows_eff > 512 and block_rows_eff % 512 == 0:
            chunk_rows = 512
        else:
            chunk_rows = block_rows_eff
        n_chunks = block_rows_eff // chunk_rows

        nblocks = pl.cdiv(rows, block_rows_eff)
        if num_parallel is None:
            num_parallel = 2 if multi_tc else 1     # engage the 2nd TC only where it exists
        num_parallel = max(1, min(int(num_parallel), nblocks))
        steps = pl.cdiv(nblocks, num_parallel)

        mask_partial = (rows % block_rows_eff) != 0
        skip_duplicate = (num_parallel * steps) != nblocks

        kernel = functools.partial(
            _bce_dice_kernel,
            valid_rows=rows, nblocks=nblocks, block_rows=block_rows_eff,
            chunk_rows=chunk_rows, n_chunks=n_chunks, steps=steps,
            mask_partial=mask_partial, skip_duplicate=skip_duplicate,
            use_approx_recip=is_v7)

        def in_map(p, i):
            # Clamp so an uneven split across the parallel axis never fetches out of
            # range; the duplicated (clamped) block skips all compute inside the kernel.
            return (jnp.minimum(p * steps + i, nblocks - 1), 0)

        itemsize = max(jnp.dtype(pr_flat.dtype).itemsize, jnp.dtype(gt_flat.dtype).itemsize)
        in_bytes = 2 * 2 * block_rows_eff * LANE * itemsize     # 2 inputs x 2 pipeline buffers
        tmp_bytes = 10 * chunk_rows * LANE * 4                  # elementwise f32 temporaries
        vmem_limit = int(min(48 * 2**20, max(32 * 2**20, in_bytes + tmp_bytes + 16 * 2**20)))

        pr2 = (pr_flat if n_main == n_elems else pr_flat[:n_main]).reshape(rows, LANE)
        gt2 = (gt_flat if n_main == n_elems else gt_flat[:n_main]).reshape(rows, LANE)

        partials = pl.pallas_call(
            kernel,
            out_shape=jax.ShapeDtypeStruct((num_parallel * 4, SUBLANE, LANE), jnp.float32),
            grid_spec=pltpu.PrefetchScalarGridSpec(
                num_scalar_prefetch=0,
                grid=(num_parallel, steps),
                in_specs=[
                    pl.BlockSpec((block_rows_eff, LANE), in_map),
                    pl.BlockSpec((block_rows_eff, LANE), in_map),
                ],
                out_specs=pl.BlockSpec((4, SUBLANE, LANE), lambda p, i: (p, 0, 0)),
            ),
            compiler_params=pltpu.CompilerParams(
                dimension_semantics=("parallel", "arbitrary"),
                vmem_limit_bytes=vmem_limit,
            ),
        )(pr2, gt2)

        sums = partials.reshape(num_parallel, 4, SUBLANE * LANE).sum(axis=(0, 2))
        tp, sp, sg, bce_sum = sums[0], sums[1], sums[2], sums[3]

    if n_main < n_elems:
        # Sub-128-element ragged tail: plain JAX (cheaper than a padded full-array copy).
        xt = pr_flat[n_main:].astype(jnp.float32)
        gt_tail = gt_flat[n_main:].astype(jnp.float32)
        st = jax.nn.sigmoid(xt)
        tp = tp + jnp.sum(gt_tail * st)
        sp = sp + jnp.sum(st)
        sg = sg + jnp.sum(gt_tail)
        bce_sum = bce_sum + jnp.sum(jnp.maximum(xt, 0.0) - xt * gt_tail
                                    + jnp.log1p(jnp.exp(-jnp.abs(xt))))

    fp = sp - tp
    fn = sg - tp
    score = (2.0 * tp + eps) / (2.0 * tp + fn + fp + eps)   # beta = 1
    dice = 1.0 - score
    bce = bce_sum / float(n_elems)
    return lambda_dice * dice + lambda_bce * bce


def _reference_loss(y_pr, y_gt, eps=1e-7, lambda_dice=1.0, lambda_bce=1.0):
    """Plain-JAX reference mirroring the PyTorch module, for sanity checking."""
    x = y_pr.astype(jnp.float32)
    g = y_gt.astype(jnp.float32)
    s = jax.nn.sigmoid(x)
    tp = jnp.sum(g * s)
    fp = jnp.sum(s) - tp
    fn = jnp.sum(g) - tp
    score = (2.0 * tp + eps) / (2.0 * tp + fn + fp + eps)
    dice = 1.0 - score
    bce = jnp.mean(jnp.maximum(x, 0.0) - x * g + jnp.log1p(jnp.exp(-jnp.abs(x))))
    return lambda_dice * dice + lambda_bce * bce


if __name__ == "__main__":
    key = jax.random.PRNGKey(0)
    k1, k2, k3, k4 = jax.random.split(key, 4)

    # 1) Primary segmentation-style shape: batch=2, channels=4, spatial=16x16 (NCHW).
    y_pr = jax.random.normal(k1, (2, 4, 16, 16), dtype=jnp.float32)              # logits
    y_gt = (jax.random.uniform(k2, (2, 4, 16, 16)) > 0.5).astype(jnp.float32)
    ref = jax.block_until_ready(_reference_loss(y_pr, y_gt))
    loss = jax.block_until_ready(bce_dice_loss(y_pr, y_gt))
    assert jnp.allclose(loss, ref, atol=1e-5, rtol=1e-5), (loss, ref)

    # 1b) Same shape, multi-block lean path (no masking anywhere).
    loss1b = jax.block_until_ready(bce_dice_loss(y_pr, y_gt, block_rows=8))
    assert jnp.allclose(loss1b, ref, atol=1e-5, rtol=1e-5), (loss1b, ref)

    # 2) Ragged size -> single small (rows<8) kernel block + sub-128-element JAX tail.
    y_pr2 = jax.random.normal(k3, (2, 3, 7, 11), dtype=jnp.float32)
    y_gt2 = (jax.random.uniform(k4, (2, 3, 7, 11)) > 0.5).astype(jnp.float32)
    loss2 = jax.block_until_ready(bce_dice_loss(y_pr2, y_gt2))
    ref2 = jax.block_until_ready(_reference_loss(y_pr2, y_gt2))
    assert jnp.allclose(loss2, ref2, atol=1e-5, rtol=1e-5), (loss2, ref2)

    # 3) Partial final block (rows % block_rows != 0): exercises the gated in-kernel
    #    masking of the OOB tail of the last block (review correctness concern).
    y_pr3 = jax.random.normal(k1, (1, 3, 33, 35), dtype=jnp.float32)
    y_gt3 = (jax.random.uniform(k2, (1, 3, 33, 35)) > 0.5).astype(jnp.float32)
    loss3 = jax.block_until_ready(bce_dice_loss(y_pr3, y_gt3, block_rows=8))
    ref3 = jax.block_until_ready(_reference_loss(y_pr3, y_gt3))
    assert jnp.allclose(loss3, ref3, atol=1e-5, rtol=1e-5), (loss3, ref3)

    # 4) Odd block count with a forced 2-way parallel split -> clamped duplicate block
    #    is skipped entirely inside the kernel.
    y_pr4 = jax.random.normal(k3, (1, 1, 40, 128), dtype=jnp.float32)
    y_gt4 = (jax.random.uniform(k4, (1, 1, 40, 128)) > 0.5).astype(jnp.float32)
    loss4 = jax.block_until_ready(bce_dice_loss(y_pr4, y_gt4, block_rows=8, num_parallel=2))
    ref4 = jax.block_until_ready(_reference_loss(y_pr4, y_gt4))
    assert jnp.allclose(loss4, ref4, atol=1e-5, rtol=1e-5), (loss4, ref4)

    # 5) Larger input -> big DMA tile with the 512-row sub-chunked compute loop.
    y_pr5 = jax.random.normal(k1, (4, 8, 128, 128), dtype=jnp.float32)
    y_gt5 = (jax.random.uniform(k2, (4, 8, 128, 128)) > 0.5).astype(jnp.float32)
    loss5 = jax.block_until_ready(bce_dice_loss(y_pr5, y_gt5))
    ref5 = jax.block_until_ready(_reference_loss(y_pr5, y_gt5))
    assert jnp.allclose(loss5, ref5, atol=1e-4, rtol=1e-4), (loss5, ref5)

    print("KERNEL_OK")
</pallas_src>

<mosaic_0001>
module attributes {stable_mosaic.version = 11 : i64} {
  func.func @_bce_dice_kernel(%arg0: i32, %arg1: i32, %arg2: memref<16x128xf32, #tpu.memory_space<vmem>>, %arg3: memref<16x128xf32, #tpu.memory_space<vmem>>, %arg4: memref<4x8x128xf32, #tpu.memory_space<vmem>>) attributes {dimension_semantics = [#tpu.dimension_semantics<parallel>, #tpu.dimension_semantics<arbitrary>], iteration_bounds = array<i64: 1, 1>, scalar_prefetch = 0 : i64, scratch_operands = 0 : i64, tpu.core_type = #tpu.core_type<tc>, window_params = [{transform_indices = @transform_0, window_bounds = array<i64: 16, 128>}, {transform_indices = @transform_1, window_bounds = array<i64: 16, 128>}, {transform_indices = @transform_2, window_bounds = array<i64: 4, 8, 128>}]} {
    %c0_i32 = arith.constant 0 : i32
    %0 = arith.cmpi eq, %arg1, %c0_i32 : i32
    %1 = arith.extui %0 : i1 to i32
    %c0_i32_0 = arith.constant 0 : i32
    %2 = arith.cmpi ne, %1, %c0_i32_0 : i32
    scf.if %2 {
      %cst_32 = arith.constant 0.000000e+00 : f32
      %60 = vector.broadcast %cst_32 : f32 to vector<4x8x128xf32>
      %c0_33 = arith.constant 0 : index
      %c0_34 = arith.constant 0 : index
      %c0_35 = arith.constant 0 : index
      %61 = vector.load %arg4[%c0_33, %c0_34, %c0_35] : memref<4x8x128xf32, #tpu.memory_space<vmem>>, vector<4x8x128xf32>
      tpu.vector_store %arg4[%c0_33, %c0_34, %c0_35], %60 {strides = array<i32>} : memref<4x8x128xf32, #tpu.memory_space<vmem>>, vector<4x8x128xf32>,
    } else {
    }
    %c0_i32_1 = arith.constant 0 : i32
    %c16_i32 = arith.constant 16 : i32
    %3 = arith.muli %c0_i32_1, %c16_i32 : i32
    %4 = tpu.assume_multiple %3, 16 : i32
    %5 = arith.index_cast %4 : i32 to index
    %c0 = arith.constant 0 : index
    %6 = vector.load %arg2[%5, %c0] : memref<16x128xf32, #tpu.memory_space<vmem>>, vector<16x128xf32>
    %7 = arith.index_cast %4 : i32 to index
    %c0_2 = arith.constant 0 : index
    %8 = vector.load %arg3[%7, %c0_2] : memref<16x128xf32, #tpu.memory_space<vmem>>, vector<16x128xf32>
    %9 = math.absf %6 : vector<16x128xf32>
    %cst = arith.constant 0.000000e+00 : f32
    %10 = vector.broadcast %cst : f32 to vector<16x128xf32>
    %11 = arith.subf %10, %9 : vector<16x128xf32>
    %12 = math.exp %11 : vector<16x128xf32>
    %cst_3 = arith.constant 1.000000e+00 : f32
    %13 = vector.broadcast %cst_3 : f32 to vector<16x128xf32>
    %14 = arith.addf %13, %12 : vector<16x128xf32>
    %cst_4 = arith.constant 1.000000e+00 : f32
    %15 = vector.broadcast %cst_4 : f32 to vector<16x128xf32>
    %16 = arith.divf %15, %14 : vector<16x128xf32>
    %cst_5 = arith.constant 0.000000e+00 : f32
    %17 = vector.broadcast %cst_5 : f32 to vector<16x128xf32>
    %18 = arith.cmpf oge, %6, %17 : vector<16x128xf32>
    %19 = arith.mulf %12, %16 : vector<16x128xf32>
    %20 = arith.select %18, %16, %19 : vector<16x128xi1>, vector<16x128xf32>
    %cst_6 = arith.constant 0.000000e+00 : f32
    %21 = vector.broadcast %cst_6 : f32 to vector<16x128xf32>
    %22 = arith.maximumf %6, %21 : vector<16x128xf32>
    %23 = arith.mulf %6, %8 : vector<16x128xf32>
    %24 = arith.subf %22, %23 : vector<16x128xf32>
    %25 = math.log1p %12 : vector<16x128xf32>
    %26 = arith.addf %24, %25 : vector<16x128xf32>
    %27 = arith.mulf %20, %8 : vector<16x128xf32>
    %c0_7 = arith.constant 0 : index
    %c0_8 = arith.constant 0 : index
    %c0_9 = arith.constant 0 : index
    %28 = vector.load %arg4[%c0_7, %c0_8, %c0_9] : memref<4x8x128xf32, #tpu.memory_space<vmem>>, vector<1x8x128xf32>
    %29 = vector.shape_cast %28 : vector<1x8x128xf32> to vector<8x128xf32>
    %30 = vector.shape_cast %27 : vector<16x128xf32> to vector<2x8x128xf32>
    %cst_10 = arith.constant dense<0.000000e+00> : vector<8x128xf32>
    %31 = vector.multi_reduction <add>, %30, %cst_10 [0] : vector<2x8x128xf32> to vector<8x128xf32>
    %32 = arith.addf %29, %31 : vector<8x128xf32>
    %c0_11 = arith.constant 0 : index
    %c0_12 = arith.constant 0 : index
    %c0_13 = arith.constant 0 : index
    %33 = vector.load %arg4[%c0_11, %c0_12, %c0_13] : memref<4x8x128xf32, #tpu.memory_space<vmem>>, vector<1x8x128xf32>
    %34 = vector.shape_cast %33 : vector<1x8x128xf32> to vector<8x128xf32>
    %35 = vector.shape_cast %32 : vector<8x128xf32> to vector<1x8x128xf32>
    tpu.vector_store %arg4[%c0_11, %c0_12, %c0_13], %35 {strides = array<i32>} : memref<4x8x128xf32, #tpu.memory_space<vmem>>, vector<1x8x128xf32>,
    %c1 = arith.constant 1 : index
    %c0_14 = arith.constant 0 : index
    %c0_15 = arith.constant 0 : index
    %36 = vector.load %arg4[%c1, %c0_14, %c0_15] : memref<4x8x128xf32, #tpu.memory_space<vmem>>, vector<1x8x128xf32>
    %37 = vector.shape_cast %36 : vector<1x8x128xf32> to vector<8x128xf32>
    %38 = vector.shape_cast %20 : vector<16x128xf32> to vector<2x8x128xf32>
    %cst_16 = arith.constant dense<0.000000e+00> : vector<8x128xf32>
    %39 = vector.multi_reduction <add>, %38, %cst_16 [0] : vector<2x8x128xf32> to vector<8x128xf32>
    %40 = arith.addf %37, %39 : vector<8x128xf32>
    %c1_17 = arith.constant 1 : index
    %c0_18 = arith.constant 0 : index
    %c0_19 = arith.constant 0 : index
    %41 = vector.load %arg4[%c1_17, %c0_18, %c0_19] : memref<4x8x128xf32, #tpu.memory_space<vmem>>, vector<1x8x128xf32>
    %42 = vector.shape_cast %41 : vector<1x8x128xf32> to vector<8x128xf32>
    %43 = vector.shape_cast %40 : vector<8x128xf32> to vector<1x8x128xf32>
    tpu.vector_store %arg4[%c1_17, %c0_18, %c0_19], %43 {strides = array<i32>} : memref<4x8x128xf32, #tpu.memory_space<vmem>>, vector<1x8x128xf32>,
    %c2 = arith.constant 2 : index
    %c0_20 = arith.constant 0 : index
    %c0_21 = arith.constant 0 : index
    %44 = vector.load %arg4[%c2, %c0_20, %c0_21] : memref<4x8x128xf32, #tpu.memory_space<vmem>>, vector<1x8x128xf32>
    %45 = vector.shape_cast %44 : vector<1x8x128xf32> to vector<8x128xf32>
    %46 = vector.shape_cast %8 : vector<16x128xf32> to vector<2x8x128xf32>
    %cst_22 = arith.constant dense<0.000000e+00> : vector<8x128xf32>
    %47 = vector.multi_reduction <add>, %46, %cst_22 [0] : vector<2x8x128xf32> to vector<8x128xf32>
    %48 = arith.addf %45, %47 : vector<8x128xf32>
    %c2_23 = arith.constant 2 : index
    %c0_24 = arith.constant 0 : index
    %c0_25 = arith.constant 0 : index
    %49 = vector.load %arg4[%c2_23, %c0_24, %c0_25] : memref<4x8x128xf32, #tpu.memory_space<vmem>>, vector<1x8x128xf32>
    %50 = vector.shape_cast %49 : vector<1x8x128xf32> to vector<8x128xf32>
    %51 = vector.shape_cast %48 : vector<8x128xf32> to vector<1x8x128xf32>
    tpu.vector_store %arg4[%c2_23, %c0_24, %c0_25], %51 {strides = array<i32>} : memref<4x8x128xf32, #tpu.memory_space<vmem>>, vector<1x8x128xf32>,
    %c3 = arith.constant 3 : index
    %c0_26 = arith.constant 0 : index
    %c0_27 = arith.constant 0 : index
    %52 = vector.load %arg4[%c3, %c0_26, %c0_27] : memref<4x8x128xf32, #tpu.memory_space<vmem>>, vector<1x8x128xf32>
    %53 = vector.shape_cast %52 : vector<1x8x128xf32> to vector<8x128xf32>
    %54 = vector.shape_cast %26 : vector<16x128xf32> to vector<2x8x128xf32>
    %cst_28 = arith.constant dense<0.000000e+00> : vector<8x128xf32>
    %55 = vector.multi_reduction <add>, %54, %cst_28 [0] : vector<2x8x128xf32> to vector<8x128xf32>
    %56 = arith.addf %53, %55 : vector<8x128xf32>
    %c3_29 = arith.constant 3 : index
    %c0_30 = arith.constant 0 : index
    %c0_31 = arith.constant 0 : index
    %57 = vector.load %arg4[%c3_29, %c0_30, %c0_31] : memref<4x8x128xf32, #tpu.memory_space<vmem>>, vector<1x8x128xf32>
    %58 = vector.shape_cast %57 : vector<1x8x128xf32> to vector<8x128xf32>
    %59 = vector.shape_cast %56 : vector<8x128xf32> to vector<1x8x128xf32>
    tpu.vector_store %arg4[%c3_29, %c0_30, %c0_31], %59 {strides = array<i32>} : memref<4x8x128xf32, #tpu.memory_space<vmem>>, vector<1x8x128xf32>,
    %c1_i32 = arith.constant 1 : i32
    return
  }
  func.func @transform_0(%arg0: i32, %arg1: i32) -> (i32, i32) {
    %c1_i32 = arith.constant 1 : i32
    %0 = arith.muli %arg0, %c1_i32 : i32
    %1 = arith.addi %0, %arg1 : i32
    %c0_i32 = arith.constant 0 : i32
    %2 = arith.minsi %1, %c0_i32 : i32
    %c0_i32_0 = arith.constant 0 : i32
    %c0_i32_1 = arith.constant 0 : i32
    return %2, %c0_i32_0 : i32, i32
  }
  func.func @transform_1(%arg0: i32, %arg1: i32) -> (i32, i32) {
    %c1_i32 = arith.constant 1 : i32
    %0 = arith.muli %arg0, %c1_i32 : i32
    %1 = arith.addi %0, %arg1 : i32
    %c0_i32 = arith.constant 0 : i32
    %2 = arith.minsi %1, %c0_i32 : i32
    %c0_i32_0 = arith.constant 0 : i32
    %c0_i32_1 = arith.constant 0 : i32
    return %2, %c0_i32_0 : i32, i32
  }
  func.func @transform_2(%arg0: i32, %arg1: i32) -> (i32, i32, i32) {
    %c0_i32 = arith.constant 0 : i32
    %c0_i32_0 = arith.constant 0 : i32
    %c0_i32_1 = arith.constant 0 : i32
    return %arg0, %c0_i32, %c0_i32_0 : i32, i32, i32
  }
}

</mosaic_0001>

<bundles_post_ra>
// kernel: tpu_custom_call.1
= control target key start
LH: loop header
LB: loop body
LE: loop exit
PB: predicated region body
PF: predicated region fallthrough
CT: control target
= control target key end

     0   :  { %7 = vsyncpa [#allocation3], 0  ;;  %s316_s0 = inlined_call_operand.hbm [shape: f32[16,128], index: 0, kind: input, shape index: {}]   ;;  %s317_s1 = inlined_call_operand.hbm [shape: f32[16,128], index: 1, kind: input, shape index: {}]   ;;  %s318_s2 = inlined_call_operand.hbm [shape: f32[4,8,128], index: 2, kind: output, shape index: {}]  }
   0x1   :  { %8 = vsyncpa [#allocation6], 0 }
   0x2   :  { %9 = vsyncpa [#allocation4], 0  ;;  %s251_s9 = smov [#allocation2]   ;;  %s179_s13 = scalar_lea.hbm %s316_s0, 256 }
   0x3   :  { %s21_s10 = sshll.u32 %s251_s9, 4  ;;  %p180_p0 = scmp.ne.s32.totalorder %s316_s0, %s179_s13  ;;  %s22_s10 = int_to_ptr.vmem [resolvable:$true] %s21_s10 }
   0x4   :  { %p183_p1 = scmp.lt.u32.totalorder %s179_s13, %s316_s0 }
   0x6   :  { %p185_p2 = pnand %p183_p1, %p180_p0 }
   0x8   :  { %188 = shalt.err (!%p185_p2)
}
   0x9   :  { %s189_s18 = scalar_lea.vmem %s22_s10, 256  ;;  %p194_p4 = scmp.lt.s32.totalorder %s22_s10, %s22_s10 }
   0xa   :  { %p190_p3 = scmp.ne.s32.totalorder %s22_s10, %s189_s18  ;;  %p195_p5 = scmp.lt.s32.totalorder %s189_s18, %s189_s18 }
   0xc   :  { %p196_p6 = por %p195_p5, %p194_p4 }
   0xe   :  { %p197_p7 = pnand %p196_p6, %p190_p3 }
  0x10   :  { %200 = shalt.err (!%p197_p7)
}
  0x11   :  { %s252_s19 = smov 128   ;;  %s253_s20 = smov 8  }
  0x12   :  { %27 = dma.hbm_to_vmem [thread:$0]  %s316_s0, 256, %s22_s10, [#allocation3], %s252_s19, %s252_s19, %s253_s20  }
  0x13   :  { %s254_s23 = smov [#allocation5]   ;;  %s201_s27 = scalar_lea.hbm %s317_s1, 256 }
  0x14   :  { %s39_s24 = sshll.u32 %s254_s23, 4  ;;  %p202_p8 = scmp.ne.s32.totalorder %s317_s1, %s201_s27  ;;  %s40_s24 = int_to_ptr.vmem [resolvable:$true] %s39_s24 }
  0x15   :  { %p205_p9 = scmp.lt.u32.totalorder %s201_s27, %s317_s1 }
  0x17   :  { %p207_p10 = pnand %p205_p9, %p202_p8 }
  0x19   :  { %210 = shalt.err (!%p207_p10)
}
  0x1a   :  { %s211_s4 = scalar_lea.vmem %s40_s24, 256  ;;  %p216_p12 = scmp.lt.s32.totalorder %s40_s24, %s40_s24 }
  0x1b   :  { %p212_p11 = scmp.ne.s32.totalorder %s40_s24, %s211_s4  ;;  %p217_p13 = scmp.lt.s32.totalorder %s211_s4, %s211_s4 }
  0x1d   :  { %p218_p0 = por %p217_p13, %p216_p12 }
  0x1f   :  { %p219_p1 = pnand %p218_p0, %p212_p11 }
  0x21   :  { %222 = shalt.err (!%p219_p1)
}
  0x22   :  { %45 = dma.hbm_to_vmem [thread:$0]  %s317_s1, 256, %s40_s24, [#allocation6], %s252_s19, %s252_s19, %s253_s20  }
  0x23   :  { %245 = dma.done.wait [#allocation3], 256  }
  0x24   :  { %246 = vsyncadd [#allocation3], 4294967040 }
  0x25   :  { %247 = dma.done.wait [#allocation6], 256  }
  0x26   :  { %248 = vsyncadd [#allocation6], 4294967040  ;;  %v68_v0 = vld [vmem:[#allocation2] sm:$0xff]  ;;  %v69_v1 = vld [vmem:[#allocation2 + $0x8] sm:$0xff]  ;;  %s255_s1 = smov [#allocation7]  }
  0x27   :  { %v70_v2 = vld [vmem:[#allocation5] sm:$0xff]  ;;  %v71_v3 = vld [vmem:[#allocation5 + $0x8] sm:$0xff]  ;;  %v72_v4 = vand.u32 2147483647, %v68_v0  ;;  %v73_v5 = vand.u32 2147483647, %v69_v1 }
  0x28   :  { %v131_v6 = vadd.f32 %v71_v3, %v70_v2  ;;  %v92_v18 = vmax.f32 %v68_v0, 0.0  ;;  %v94_v19 = vmul.f32 %v70_v2, %v68_v0  ;;  %v93_v22 = vmax.f32 %v69_v1, 0.0  ;;  %s144_s6 = sshll.u32 %s255_s1, 4  ;;  %s145_s6 = int_to_ptr.vmem [resolvable:$true] %s144_s6 }
  0x29   :  { %v74_v7 = vsub.f32 0.0, %v72_v4  ;;  %v75_v8 = vsub.f32 0.0, %v73_v5  ;;  %v95_v23 = vmul.f32 %v71_v3, %v69_v1  ;;  %vm86_vm0 = vcmp.ge.f32.partialorder %v68_v0, 0.0  ;;  %s223_s7 = scalar_lea.vmem %s145_s6, 512  ;;  %p228_p3 = scmp.lt.s32.totalorder %s145_s6, %s145_s6 }
  0x2a   :  { %133 = vst [vmem:[#allocation7 + $0x10] sm:$0xff] %v131_v6  ;;  %vm87_vm1 = vcmp.ge.f32.partialorder %v69_v1, 0.0  ;;  %v96_v31 = vsub.f32 %v92_v18, %v94_v19  ;;  %p224_p2 = scmp.ne.s32.totalorder %s145_s6, %s223_s7  ;;  %p229_p4 = scmp.lt.s32.totalorder %s223_s7, %s223_s7 }
  0x2b   :  { %v76_v9 = vmul.f32 1.442695, %v74_v7  ;;  %v78_v10 = vmul.f32 1.442695, %v75_v8  ;;  %v97_v35 = vsub.f32 %v93_v22, %v95_v23 }
  0x2c   :  { %p230_p5 = por %p229_p4, %p228_p3 }
  0x2d   :  { %167 = vpow2.f32 %v76_v9 }
  0x2e   :  { %169 = vpow2.f32 %v78_v10  ;;  %p231_p6 = pnand %p230_p5, %p224_p2 }
  0x37   :  { %v168_v11 = vpop.eup %167 }
  0x38   :  { %v170_v12 = vpop.eup %169  ;;  %v80_v13 = vadd.f32 1.0, %v168_v11  ;;  %v101_v15 = vmul.f32 -0.5, %v168_v11  ;;  %v104_v20 = vand.u32 2147483647, %v168_v11 }
  0x39   :  { %v81_v14 = vadd.f32 1.0, %v170_v12  ;;  %v110_v16 = vmul.f32 -0.5, %v170_v12  ;;  %v113_v24 = vand.u32 2147483647, %v170_v12 }
  0x3a   :  { %171 = vrcp.f32 %v80_v13  ;;  %v102_v17 = vadd.f32 1.0, %v101_v15  ;;  %vm105_vm2 = vcmp.lt.f32.partialorder %v104_v20, 0.0004427343 }
  0x3b   :  { %173 = vrcp.f32 %v81_v14  ;;  %v111_v21 = vadd.f32 1.0, %v110_v16  ;;  %vm114_vm3 = vcmp.lt.f32.partialorder %v113_v24, 0.0004427343 }
  0x3c   :  { %175 = vlog2.f32 %v80_v13  ;;  %v103_v28 = vmul.f32 %v168_v11, %v102_v17 }
  0x3d   :  { %177 = vlog2.f32 %v81_v14  ;;  %v112_v32 = vmul.f32 %v170_v12, %v111_v21 }
  0x44   :  { %v172_v25 = vpop.eup %171 }
  0x45   :  { %v174_v26 = vpop.eup %173  ;;  %v88_v27 = vmul.f32 %v172_v25, %v168_v11 }
  0x46   :  { %v176_v29 = vpop.eup %175  ;;  %v89_v30 = vmul.f32 %v174_v26, %v170_v12 }
  0x47   :  { %v178_v33 = vpop.eup %177  ;;  %v90_v34 = vsel %vm86_vm0, %v172_v25, %v88_v27  ;;  %v100_v36 = vmul.f32 0.6931472, %v176_v29 }
  0x48   :  { %v91_v37 = vsel %vm87_vm1, %v174_v26, %v89_v30  ;;  %v118_v38 = vmul.f32 %v90_v34, %v70_v2  ;;  %v109_v39 = vmul.f32 0.6931472, %v178_v33 }
  0x49   :  { %v119_v40 = vmul.f32 %v91_v37, %v71_v3  ;;  %v126_v41 = vadd.f32 %v91_v37, %v90_v34  ;;  %v106_v42 = vsel %vm105_vm2, %v103_v28, %v100_v36 }
  0x4a   :  { %v115_v43 = vsel %vm114_vm3, %v112_v32, %v109_v39  ;;  %v116_v44 = vadd.f32 %v106_v42, %v96_v31 }
  0x4b   :  { %v121_v45 = vadd.f32 %v119_v40, %v118_v38  ;;  %v117_v46 = vadd.f32 %v115_v43, %v97_v35  ;;  %128 = vst [vmem:[#allocation7 + $0x8] sm:$0xff] %v126_v41 }
  0x4d   :  { %v136_v47 = vadd.f32 %v117_v46, %v116_v44  ;;  %123 = vst [vmem:[#allocation7] sm:$0xff] %v121_v45 }
  0x4f   :  { %138 = vst [vmem:[#allocation7 + $0x18] sm:$0xff] %v136_v47 }
  0x50   :  { %234 = shalt.err (!%p231_p6)
}
  0x51   :  { %s235_s10 = scalar_lea.hbm %s318_s2, 512 }
  0x52   :  { %p236_p7 = scmp.ne.s32.totalorder %s318_s2, %s235_s10  ;;  %p239_p8 = scmp.lt.u32.totalorder %s235_s10, %s318_s2 }
  0x54   :  { %p241_p9 = pnand %p239_p8, %p236_p7 }
  0x56   :  { %244 = shalt.err (!%p241_p9)
}
  0x57   :  { %150 = dma.vmem_to_hbm [thread:$0]  %s145_s6, 512, %s318_s2, [#allocation4], %s252_s19, %s252_s19, %s253_s20  }
  0x58   :  { %249 = dma.done.wait [#allocation4], 512  }
  0x59   :  { %250 = vsyncadd [#allocation4], 4294966784 }
  0x5a   :  { %154 = vsyncpa [#allocation3], 1 }
  0x5b   :  { %155 = vsyncpa [#allocation6], 1 }
  0x5c   :  { %156 = vsyncpa [#allocation4], 1 }

</bundles_post_ra>
